<compile_context>
chip_gen: v6e
topology: v6e:2x2x1
jax: 0.10.0
libtpu: 0.0.40
codegen_flags: <defaults>
</compile_context>

<pallas_src>
import functools

import jax
import jax.numpy as jnp
from jax.experimental import pallas as pl
from jax.experimental.pallas import tpu as pltpu


def _round_up(x: int, m: int) -> int:
    return ((x + m - 1) // m) * m


def _choose_batch_tile(B: int, row_out_bytes: int, row_in_bytes: int) -> int:
    """Batch tile so the output block is ~4 MiB and the double-buffered VMEM
    footprint stays well under v7x's 64 MiB physical VMEM (also fine on v5e/v6e)."""
    TARGET_BLOCK = 4 * 1024 * 1024      # ~85%+ of HBM roofline territory
    MIN_BLOCK = 1 * 1024 * 1024         # don't shrink below this for grid >= 4
    DB_BUDGET = 32 * 1024 * 1024        # double-buffered in+out block budget

    tb = max(8, TARGET_BLOCK // max(row_out_bytes, 1))
    per_row_db = 2 * (row_out_bytes + row_in_bytes)
    tb = min(tb, max(8, DB_BUDGET // max(per_row_db, 1)))
    # Prefer >= 4 grid steps (pipelining + 2-TC sharding on v7x), but never at the
    # cost of dropping below ~1 MiB output blocks (per-step overhead amortization).
    tb_grid4 = _round_up((B + 3) // 4, 8)
    tb_min = max(8, MIN_BLOCK // max(row_out_bytes, 1))
    if tb_grid4 >= tb_min:
        tb = min(tb, tb_grid4)
    tb = min(tb, _round_up(B, 8))
    tb = max(8, (tb // 8) * 8)
    return tb


def _outer_flat_kernel(a_ref, b_ref, r_ref, t_ref, o_ref):
    # a_ref: (TB, M), b_ref: (TB, N)
    # r_ref: (M, M*N) one-hot "repeat_interleave" matrix: r[m, m*N + n] = 1
    # t_ref: (N, M*N) one-hot "tile" matrix:              t[n, m*N + n] = 1
    # o_ref: (TB, M*N)  -- lane-dense flattened outer product.
    # MXU handles the rank-1 expansion (exact one-hot gathers), VPU does the product.
    a_rep = jnp.dot(a_ref[...], r_ref[...], preferred_element_type=jnp.float32)
    b_tile = jnp.dot(b_ref[...], t_ref[...], preferred_element_type=jnp.float32)
    o_ref[...] = (a_rep * b_tile).astype(o_ref.dtype)


def _outer_3d_kernel(a_ref, b_ref, o_ref):
    # Fallback path (used when N is already a multiple of 128, for non-float dtypes,
    # or when M*N is too large for the one-hot trick): plain VPU broadcast multiply.
    o_ref[...] = (a_ref[...][:, :, None] * b_ref[...][:, None, :]).astype(o_ref.dtype)


@functools.partial(jax.jit, static_argnames=("reshape", "batch_tile"))
def outer_layer(tensor_a: jax.Array, tensor_b: jax.Array, reshape: bool = False,
                batch_tile: int | None = None):
    """Pallas implementation of OuterLayer.forward.

    tensor_a: (..., M), tensor_b: (..., N) with identical leading dims.
    Returns (..., M, N) if reshape is False, else (..., M*N).
    """
    assert tensor_a.shape[:-1] == tensor_b.shape[:-1], "batch dims must match"
    M = tensor_a.shape[-1]
    N = tensor_b.shape[-1]
    MN = M * N
    batch_shape = tensor_a.shape[:-1]

    B = 1
    for d in batch_shape:
        B *= d

    out_dtype = jnp.result_type(tensor_a.dtype, tensor_b.dtype)
    itemsize = jnp.dtype(out_dtype).itemsize

    a2 = tensor_a.reshape(B, M).astype(out_dtype)
    b2 = tensor_b.reshape(B, N).astype(out_dtype)

    onehot_bytes = (M + N) * MN * itemsize
    use_flat = (jnp.issubdtype(out_dtype, jnp.floating)
                and (N % 128 != 0)                      # 3-D blocks already lane-dense otherwise
                and onehot_bytes <= 2 * 1024 * 1024)    # keep the constant matrices small

    row_out = MN * itemsize
    row_in = (M + N) * itemsize
    tb = batch_tile if batch_tile is not None else _choose_batch_tile(B, row_out, row_in)
    tb = max(8, min(tb, _round_up(B, 8)))
    tb = (tb // 8) * 8

    # Pad the flattened batch to a multiple of the tile instead of asserting.
    B_pad = _round_up(B, tb)
    if B_pad != B:
        a2 = jnp.pad(a2, ((0, B_pad - B), (0, 0)))
        b2 = jnp.pad(b2, ((0, B_pad - B), (0, 0)))

    grid = (B_pad // tb,)
    cost = pl.CostEstimate(
        flops=2 * B_pad * MN,
        transcendentals=0,
        bytes_accessed=B_pad * MN * itemsize + B_pad * (M + N) * itemsize,
    )
    db_bytes = 2 * tb * (row_out + row_in) + 2 * onehot_bytes
    vmem_limit = int(min(48 * 1024 * 1024,
                         max(16 * 1024 * 1024, db_bytes + 8 * 1024 * 1024)))
    cparams = pltpu.CompilerParams(dimension_semantics=("parallel",),
                                   vmem_limit_bytes=vmem_limit)

    if use_flat:
        # Tiny constant one-hot matrices built outside the kernel (constant-folded).
        j = jnp.arange(MN)
        r_mat = (j[None, :] // N == jnp.arange(M)[:, None]).astype(out_dtype)  # (M, MN)
        t_mat = (j[None, :] % N == jnp.arange(N)[:, None]).astype(out_dtype)   # (N, MN)

        out = pl.pallas_call(
            _outer_flat_kernel,
            out_shape=jax.ShapeDtypeStruct((B_pad, MN), out_dtype),
            grid_spec=pltpu.PrefetchScalarGridSpec(
                num_scalar_prefetch=0,
                grid=grid,
                in_specs=[
                    pl.BlockSpec((tb, M), lambda i: (i, 0)),
                    pl.BlockSpec((tb, N), lambda i: (i, 0)),
                    pl.BlockSpec((M, MN), lambda i: (0, 0)),
                    pl.BlockSpec((N, MN), lambda i: (0, 0)),
                ],
                out_specs=pl.BlockSpec((tb, MN), lambda i: (i, 0)),
            ),
            compiler_params=cparams,
            cost_estimate=cost,
        )(a2, b2, r_mat, t_mat)
        out = out[:B]
    else:
        out = pl.pallas_call(
            _outer_3d_kernel,
            out_shape=jax.ShapeDtypeStruct((B_pad, M, N), out_dtype),
            grid_spec=pltpu.PrefetchScalarGridSpec(
                num_scalar_prefetch=0,
                grid=grid,
                in_specs=[
                    pl.BlockSpec((tb, M), lambda i: (i, 0)),
                    pl.BlockSpec((tb, N), lambda i: (i, 0)),
                ],
                out_specs=pl.BlockSpec((tb, M, N), lambda i: (i, 0, 0)),
            ),
            compiler_params=cparams,
            cost_estimate=cost,
        )(a2, b2)
        out = out[:B].reshape(B, MN)

    if reshape:
        return out.reshape(*batch_shape, MN)
    return out.reshape(*batch_shape, M, N)


def _reference(tensor_a, tensor_b, reshape=False):
    out = tensor_a[..., :, None] * tensor_b[..., None, :]
    if reshape:
        out = out.reshape(*out.shape[:-2], out.shape[-2] * out.shape[-1])
    return out


if __name__ == "__main__":
    key = jax.random.PRNGKey(0)
    k_a, k_b = jax.random.split(key)

    # (..., M) and (..., N): batch dims (2, 4), M=8, N=32
    M, N = 8, 32
    tensor_a = jax.random.normal(k_a, (2, 4, M), dtype=jnp.float32)
    tensor_b = jax.random.normal(k_b, (2, 4, N), dtype=jnp.float32)

    # reshape=False path (lane-dense flat kernel)
    out = jax.block_until_ready(outer_layer(tensor_a, tensor_b, reshape=False))
    ref = _reference(tensor_a, tensor_b, reshape=False)
    assert out.shape == (2, 4, M, N), out.shape
    assert jnp.allclose(out, ref, atol=1e-6, rtol=1e-6)

    # reshape=True path
    out_r = jax.block_until_ready(outer_layer(tensor_a, tensor_b, reshape=True))
    ref_r = _reference(tensor_a, tensor_b, reshape=True)
    assert out_r.shape == (2, 4, M * N), out_r.shape
    assert jnp.allclose(out_r, ref_r, atol=1e-6, rtol=1e-6)

    # batch not divisible by the tile -> exercises the padding path
    k_c, k_d = jax.random.split(k_a)
    a3 = jax.random.normal(k_c, (3, M), dtype=jnp.float32)
    b3 = jax.random.normal(k_d, (3, N), dtype=jnp.float32)
    out3 = jax.block_until_ready(outer_layer(a3, b3))
    assert jnp.allclose(out3, _reference(a3, b3), atol=1e-6, rtol=1e-6)

    # N multiple of 128 -> exercises the already-lane-dense 3-D fallback path
    k_e, k_f = jax.random.split(k_b)
    a4 = jax.random.normal(k_e, (4, M), dtype=jnp.float32)
    b4 = jax.random.normal(k_f, (4, 128), dtype=jnp.float32)
    out4 = jax.block_until_ready(outer_layer(a4, b4))
    assert jnp.allclose(out4, _reference(a4, b4), atol=1e-6, rtol=1e-6)

    print("KERNEL_OK")
</pallas_src>

<mosaic_0001>
module attributes {stable_mosaic.version = 11 : i64} {
  func.func @_outer_flat_kernel(%arg0: i32, %arg1: memref<8x8xf32, #tpu.memory_space<vmem>>, %arg2: memref<8x32xf32, #tpu.memory_space<vmem>>, %arg3: memref<8x256xf32, #tpu.memory_space<vmem>>, %arg4: memref<32x256xf32, #tpu.memory_space<vmem>>, %arg5: memref<8x256xf32, #tpu.memory_space<vmem>>) attributes {dimension_semantics = [#tpu.dimension_semantics<parallel>], iteration_bounds = array<i64: 1>, scalar_prefetch = 0 : i64, scratch_operands = 0 : i64, tpu.core_type = #tpu.core_type<tc>, window_params = [{transform_indices = @transform_0, window_bounds = array<i64: 8, 8>}, {transform_indices = @transform_1, window_bounds = array<i64: 8, 32>}, {pipeline_mode = #tpu.pipeline_mode<synchronous>, transform_indices = @transform_2, window_bounds = array<i64: 8, 256>}, {pipeline_mode = #tpu.pipeline_mode<synchronous>, transform_indices = @transform_3, window_bounds = array<i64: 32, 256>}, {transform_indices = @transform_4, window_bounds = array<i64: 8, 256>}]} {
    %c0 = arith.constant 0 : index
    %c0_0 = arith.constant 0 : index
    %0 = vector.load %arg1[%c0, %c0_0] : memref<8x8xf32, #tpu.memory_space<vmem>>, vector<8x8xf32>
    %c0_1 = arith.constant 0 : index
    %c0_2 = arith.constant 0 : index
    %1 = vector.load %arg3[%c0_1, %c0_2] : memref<8x256xf32, #tpu.memory_space<vmem>>, vector<8x256xf32>
    %cst = arith.constant dense<0.000000e+00> : vector<8x256xf32>
    %2 = tpu.matmul %0, %1, %cst {dimension_numbers = #tpu.dot_dimension_numbers<[1], [0], [0], [1], [0, 0, 1, 1], [], []>} : vector<8x8xf32>, vector<8x256xf32>, vector<8x256xf32> -> vector<8x256xf32>
    %c0_3 = arith.constant 0 : index
    %c0_4 = arith.constant 0 : index
    %3 = vector.load %arg2[%c0_3, %c0_4] : memref<8x32xf32, #tpu.memory_space<vmem>>, vector<8x32xf32>
    %c0_5 = arith.constant 0 : index
    %c0_6 = arith.constant 0 : index
    %4 = vector.load %arg4[%c0_5, %c0_6] : memref<32x256xf32, #tpu.memory_space<vmem>>, vector<32x256xf32>
    %cst_7 = arith.constant dense<0.000000e+00> : vector<8x256xf32>
    %5 = tpu.matmul %3, %4, %cst_7 {dimension_numbers = #tpu.dot_dimension_numbers<[1], [0], [0], [1], [0, 0, 1, 1], [], []>} : vector<8x32xf32>, vector<32x256xf32>, vector<8x256xf32> -> vector<8x256xf32>
    %6 = arith.mulf %2, %5 : vector<8x256xf32>
    %c0_8 = arith.constant 0 : index
    %c0_9 = arith.constant 0 : index
    %7 = vector.load %arg5[%c0_8, %c0_9] : memref<8x256xf32, #tpu.memory_space<vmem>>, vector<8x256xf32>
    tpu.vector_store %arg5[%c0_8, %c0_9], %6 {strides = array<i32>} : memref<8x256xf32, #tpu.memory_space<vmem>>, vector<8x256xf32>,
    return
  }
  func.func @transform_0(%arg0: i32) -> (i32, i32) {
    %c0_i32 = arith.constant 0 : i32
    %c0_i32_0 = arith.constant 0 : i32
    return %arg0, %c0_i32 : i32, i32
  }
  func.func @transform_1(%arg0: i32) -> (i32, i32) {
    %c0_i32 = arith.constant 0 : i32
    %c0_i32_0 = arith.constant 0 : i32
    return %arg0, %c0_i32 : i32, i32
  }
  func.func @transform_2(%arg0: i32) -> (i32, i32) {
    %c0_i32 = arith.constant 0 : i32
    %c0_i32_0 = arith.constant 0 : i32
    %c0_i32_1 = arith.constant 0 : i32
    return %c0_i32, %c0_i32_0 : i32, i32
  }
  func.func @transform_3(%arg0: i32) -> (i32, i32) {
    %c0_i32 = arith.constant 0 : i32
    %c0_i32_0 = arith.constant 0 : i32
    %c0_i32_1 = arith.constant 0 : i32
    return %c0_i32, %c0_i32_0 : i32, i32
  }
  func.func @transform_4(%arg0: i32) -> (i32, i32) {
    %c0_i32 = arith.constant 0 : i32
    %c0_i32_0 = arith.constant 0 : i32
    return %arg0, %c0_i32 : i32, i32
  }
}

</mosaic_0001>

<bundles_post_ra>
// kernel: outer_layer.1
= control target key start
LH: loop header
LB: loop body
LE: loop exit
PB: predicated region body
PF: predicated region fallthrough
CT: control target
= control target key end

     0   :  { %v190_v3 = vmov 0.0   ;;  %vm20_vm0 = vcmask 64512   ;;  %vm104_vm1 = vcmask 261120   ;;  %s258_s3 = inlined_call_operand.vmem [shape: f32[32,256], index: 3, kind: input, shape index: {}]   ;;  %s259_s2 = inlined_call_operand.vmem [shape: f32[8,256], index: 2, kind: input, shape index: {}]   ;;  %s260_s0 = inlined_call_operand.vmem [shape: f32[8,8], index: 0, kind: input, shape index: {}]   ;;  %s261_s1 = inlined_call_operand.vmem [shape: f32[8,32], index: 1, kind: input, shape index: {}]   ;;  %s262_s4 = inlined_call_operand.vmem [shape: f32[8,256], index: 4, kind: output, shape index: {}]  }
   0x1   :  { %v103_v0 = vld [vmem:[%s258_s3 + $0x38] sm:$0xff]  ;;  %v102_v1 = vld [vmem:[%s258_s3 + $0x30] sm:$0xff]  ;;  %v101_v2 = vld [vmem:[%s258_s3 + $0x28] sm:$0xff]  ;;  %88 = vmatprep.mubr.f32.mxu0 %v190_v3  ;;  %172 = vmatprep.mubr.f32.mxu1 %v190_v3 }
   0x2   :  { %132 = vmatprep.subr.mxu1 %v103_v0  ;;  %v100_v4 = vld [vmem:[%s258_s3 + $0x20] sm:$0xff]  ;;  %v19_v5 = vld [vmem:[%s259_s2 + $0x8] sm:$0xff]  ;;  %v99_v6 = vld [vmem:[%s258_s3 + $0x18] sm:$0xff] }
   0x3   :  { %133 = vmatpush1.msra.mxu1 %v102_v1  ;;  %54 = vmatprep.subr.mxu0 %v19_v5  ;;  %v18_v7 = vld [vmem:[%s259_s2] sm:$0xff]  ;;  %v98_v9 = vld [vmem:[%s258_s3 + $0x10] sm:$0xff]  ;;  %v97_v10 = vld [vmem:[%s258_s3 + $0x8] sm:$0xff] }
   0x4   :  { %v17_v8 = vld [vmem:[%s260_s0] sm:$0xff]  ;;  %134 = vmatprep.subr.mxu1 %v101_v2  ;;  %55 = vmatpush1.msra.mxu0 %v18_v7 }
   0x5   :  { %135 = vmatpush1.msra.mxu1 %v100_v4  ;;  %187 = vmatmul.mubr.msk.f32.vlgmr.msra.gmra.mxu0 %vm20_vm0, %v17_v8  ;;  %v96_v11 = vld [vmem:[%s258_s3] sm:$0xff] }
   0x6   :  { %136 = vmatprep.subr.mxu1 %v99_v6  ;;  %v95_v12 = vld [vmem:[%s261_s1] sm:$0xff] }
   0x7   :  { %137 = vmatpush1.msra.mxu1 %v98_v9 }
   0x8   :  { %138 = vmatprep.subr.mxu1 %v97_v10 }
   0x9   :  { %139 = vmatpush1.msra.mxu1 %v96_v11 }
   0xa   :  { %188 = vmatmul.mubr.msk.f32.vlgmr.msra.gmra.mxu1 %vm104_vm1, %v95_v12 }
  0xc5   :  { %v90_v13 = vpop.f32.mrf.mxu0 }
  0xc7   :  { %v92_v16 = vpop.f32.mrf.mxu0 }
  0xca   :  { %v174_v14 = vpop.f32.mrf.mxu1 }
  0xcb   :  { %v179_v15 = vmul.f32 %v174_v14, %v90_v13 }
  0xcc   :  { %v176_v17 = vpop.f32.mrf.mxu1 }
  0xcd   :  { %181 = vst [vmem:[%s262_s4] sm:$0xff] %v179_v15  ;;  %v180_v18 = vmul.f32 %v176_v17, %v92_v16 }
  0xcf   :  { %182 = vst [vmem:[%s262_s4 + $0x8] sm:$0xff] %v180_v18 }

</bundles_post_ra>
